<compile_context>
chip_gen: v7x
topology: tpu7x:2x2x1
jax: 0.10.0
libtpu: 0.0.40
codegen_flags: <defaults>
</compile_context>

<pallas_src>
import functools

import jax
import jax.numpy as jnp
from jax import lax
from jax.experimental import pallas as pl
from jax.experimental.pallas import tpu as pltpu


def _skipgram_kernel(e_ref, w_ref, b_ref, ctx_ref,
                     logits_ref, lse_ref, tgt_ref,
                     m_sc, l_sc, tgt_sc,
                     *, vocab_size, v_padded):
    # e_ref:      (TB, D)  f32   center-word embeddings (one B tile)
    # w_ref:      (TV, D)  f32   linear weight tile (native (V, D) layout)
    # b_ref:      (1, TV)  f32   bias tile
    # ctx_ref:    (TB, C)  i32   context word ids
    # logits_ref: (TB, TV) f32   logits tile output
    # lse_ref:    (TB, 1)  f32   logsumexp over the full vocab (written at last k)
    # tgt_ref:    (TB, 1)  f32   sum_c logits[b, ctx[b, c]]     (written at last k)
    # m_sc/l_sc/tgt_sc: (TB, 1) f32 VMEM accumulators (online softmax state)
    k = pl.program_id(1)
    nv = pl.num_programs(1)
    tb, tv = logits_ref.shape

    @pl.when(k == 0)
    def _init():
        m_sc[...] = jnp.full_like(m_sc, -jnp.inf)
        l_sc[...] = jnp.zeros_like(l_sc)
        tgt_sc[...] = jnp.zeros_like(tgt_sc)

    # logits tile = e @ w.T + bias  (contract on D; weight stays (V, D) — no transpose)
    s = lax.dot_general(
        e_ref[...], w_ref[...],
        dimension_numbers=(((1,), (1,)), ((), ())),
        preferred_element_type=jnp.float32,
    ) + b_ref[...]                                                 # (TB, TV) f32
    logits_ref[...] = s

    # ---- target-logit gather: lane-iota compare against the C context ids ----
    lane = lax.broadcasted_iota(jnp.int32, (tb, tv), 1)
    global_idx = lane + k * tv                                     # vocab ids of this tile
    ctx = ctx_ref[...]                                             # (TB, C) i32
    C = ctx.shape[1]
    counts = jnp.zeros((tb, tv), jnp.float32)
    for c in range(C):                                             # C is tiny & static -> unrolled
        counts = counts + (global_idx == ctx[:, c:c + 1]).astype(jnp.float32)
    # padded vocab lanes have counts == 0 and finite (zero-ish) logits -> no NaNs here
    tgt_sc[...] += jnp.sum(counts * s, axis=-1, keepdims=True)

    # ---- online logsumexp over vocab tiles (mask padded lanes to -inf) ----
    if v_padded != vocab_size:
        s_lse = jnp.where(global_idx < vocab_size, s, jnp.float32(-jnp.inf))
    else:
        s_lse = s
    m_prev = m_sc[...]
    m_new = jnp.maximum(m_prev, jnp.max(s_lse, axis=-1, keepdims=True))
    l_sc[...] = (l_sc[...] * jnp.exp(m_prev - m_new)
                 + jnp.sum(jnp.exp(s_lse - m_new), axis=-1, keepdims=True))
    m_sc[...] = m_new

    @pl.when(k == nv - 1)
    def _finalize():
        lse_ref[...] = m_sc[...] + jnp.log(l_sc[...])
        tgt_ref[...] = tgt_sc[...]


def _pick_tb(b):
    if b <= 256:
        return b
    for t in (256, 128, 64, 32, 16, 8):
        if b % t == 0:
            return t
    return b


def _pick_tv(v_pad):
    for t in (2048, 1024, 512, 256, 128):
        if t <= v_pad and v_pad % t == 0:
            return t
    return v_pad


def skipgram_forward(centers, contexts, embedding, weight, bias,
                     *, tb=None, tv=None):
    """centers: (B,) int; contexts: (B, C) int;
    embedding: (V, D) f32; weight: (V, D) f32; bias: (V,) f32.
    Returns (p_ctx (B, C, V), loss scalar) matching the PyTorch forward."""
    B = centers.shape[0]
    C = contexts.shape[1]
    V, D = weight.shape

    # Glue: nn.Embedding lookup (data-dependent row gather) stays in JAX.
    e_ctr = embedding[centers].astype(jnp.float32)                 # (B, D)
    ctx_i32 = contexts.astype(jnp.int32)                           # (B, C)
    w = weight.astype(jnp.float32)
    b1 = bias.astype(jnp.float32)

    # Pad vocab to a lane multiple so every logits tile is lane-dense.
    v_pad = ((V + 127) // 128) * 128
    if v_pad != V:
        w = jnp.pad(w, ((0, v_pad - V), (0, 0)))
        b1 = jnp.pad(b1, (0, v_pad - V))
    b2d = b1.reshape(1, v_pad)

    TB = tb if tb is not None else _pick_tb(B)
    TV = tv if tv is not None else _pick_tv(v_pad)
    assert B % TB == 0 and v_pad % TV == 0
    nb, nv = B // TB, v_pad // TV

    kernel = functools.partial(_skipgram_kernel, vocab_size=V, v_padded=v_pad)

    logits_pad, lse, tgt_sum = pl.pallas_call(
        kernel,
        out_shape=(
            jax.ShapeDtypeStruct((B, v_pad), jnp.float32),
            jax.ShapeDtypeStruct((B, 1), jnp.float32),
            jax.ShapeDtypeStruct((B, 1), jnp.float32),
        ),
        grid_spec=pltpu.PrefetchScalarGridSpec(
            num_scalar_prefetch=0,
            grid=(nb, nv),
            in_specs=[
                pl.BlockSpec((TB, D), lambda i, k: (i, 0)),   # center embeddings
                pl.BlockSpec((TV, D), lambda i, k: (k, 0)),   # weight streamed in (V, D) layout
                pl.BlockSpec((1, TV), lambda i, k: (0, k)),   # bias tile
                pl.BlockSpec((TB, C), lambda i, k: (i, 0)),   # context ids
            ],
            out_specs=(
                pl.BlockSpec((TB, TV), lambda i, k: (i, k)),  # logits (lane-dense tiles)
                pl.BlockSpec((TB, 1), lambda i, k: (i, 0)),   # logsumexp (resident over k)
                pl.BlockSpec((TB, 1), lambda i, k: (i, 0)),   # target-logit sums
            ),
            scratch_shapes=[
                pltpu.VMEM((TB, 1), jnp.float32),             # running max
                pltpu.VMEM((TB, 1), jnp.float32),             # running sum-exp
                pltpu.VMEM((TB, 1), jnp.float32),             # running target-logit sum
            ],
        ),
        compiler_params=pltpu.CompilerParams(
            dimension_semantics=("parallel", "arbitrary"),    # B tiles across TCs; V is reduction
            vmem_limit_bytes=48 * 1024 * 1024,
        ),
    )(e_ctr, w, b2d, ctx_i32)

    logits = logits_pad[:, :V] if v_pad != V else logits_pad      # (B, V)

    # loss = mean_{b,c}( logsumexp(logits[b]) - logits[b, ctx[b, c]] )
    loss = jnp.mean(lse[:, 0]) - jnp.sum(tgt_sum[:, 0]) / (B * C)

    # Match torch's .unsqueeze(1).expand(-1, C, -1). Downstream consumers that
    # only need the per-center logits should use `logits` (B, V) directly to
    # avoid a CxV-times-larger HBM write.
    p_ctx = jnp.broadcast_to(logits[:, None, :], (B, C, V))
    return p_ctx, loss


def _reference_forward(centers, contexts, embedding, weight, bias):
    """Pure-JAX reference mirroring the PyTorch forward (sanity check)."""
    e_ctr = embedding[centers]                                     # (B, D)
    logits = e_ctr @ weight.T + bias                               # (B, V)
    B, V = logits.shape
    C = contexts.shape[1]
    p_ctx = jnp.broadcast_to(logits[:, None, :], (B, C, V))
    flat_logits = p_ctx.reshape(-1, V)
    flat_tgt = contexts.reshape(-1)
    lse = jax.scipy.special.logsumexp(flat_logits, axis=-1)
    tgt_logit = jnp.take_along_axis(flat_logits, flat_tgt[:, None], axis=-1)[:, 0]
    loss = jnp.mean(lse - tgt_logit)
    return p_ctx, loss


if __name__ == "__main__":
    def run_case(vocab, emb, batch, ctx_len, tv=None):
        key = jax.random.PRNGKey(0)
        k_emb, k_w, k_b, k_ctr, k_ctx = jax.random.split(key, 5)

        # Parameter init mirroring PyTorch defaults:
        #   nn.Embedding: N(0, 1);  nn.Linear: U(-1/sqrt(D), 1/sqrt(D)).
        embedding = jax.random.normal(k_emb, (vocab, emb), dtype=jnp.float32)
        bound = 1.0 / (emb ** 0.5)
        weight = jax.random.uniform(k_w, (vocab, emb), dtype=jnp.float32,
                                    minval=-bound, maxval=bound)
        bias = jax.random.uniform(k_b, (vocab,), dtype=jnp.float32,
                                  minval=-bound, maxval=bound)
        centers = jax.random.randint(k_ctr, (batch,), 0, vocab, dtype=jnp.int32)
        contexts = jax.random.randint(k_ctx, (batch, ctx_len), 0, vocab, dtype=jnp.int32)

        p_ctx, loss = skipgram_forward(centers, contexts, embedding, weight, bias, tv=tv)
        jax.block_until_ready((p_ctx, loss))

        p_ref, loss_ref = _reference_forward(centers, contexts, embedding, weight, bias)
        assert p_ctx.shape == (batch, ctx_len, vocab)
        assert jnp.allclose(p_ctx, p_ref, atol=1e-4, rtol=1e-4)
        assert jnp.allclose(loss, loss_ref, atol=1e-4, rtol=1e-4)

    # Multi-tile vocab reduction: 4 vocab tiles of 128 (exercises online logsumexp).
    run_case(vocab=512, emb=128, batch=8, ctx_len=4, tv=128)
    # Unaligned vocab (300 -> padded to 384): exercises padded-lane -inf masking.
    run_case(vocab=300, emb=128, batch=8, ctx_len=4)

    print("KERNEL_OK")
</pallas_src>

<mosaic_0001>
module attributes {stable_mosaic.version = 11 : i64} {
  func.func @_skipgram_kernel(%arg0: i32, %arg1: i32, %arg2: memref<8x128xf32, #tpu.memory_space<vmem>>, %arg3: memref<128x128xf32, #tpu.memory_space<vmem>>, %arg4: memref<1x128xf32, #tpu.memory_space<vmem>>, %arg5: memref<8x4xi32, #tpu.memory_space<vmem>>, %arg6: memref<8x128xf32, #tpu.memory_space<vmem>>, %arg7: memref<8x1xf32, #tpu.memory_space<vmem>>, %arg8: memref<8x1xf32, #tpu.memory_space<vmem>>, %arg9: memref<8x1xf32, #tpu.memory_space<vmem>>, %arg10: memref<8x1xf32, #tpu.memory_space<vmem>>, %arg11: memref<8x1xf32, #tpu.memory_space<vmem>>) attributes {dimension_semantics = [#tpu.dimension_semantics<parallel>, #tpu.dimension_semantics<arbitrary>], iteration_bounds = array<i64: 1, 4>, scalar_prefetch = 0 : i64, scratch_operands = 3 : i64, tpu.core_type = #tpu.core_type<tc>, window_params = [{transform_indices = @transform_0, window_bounds = array<i64: 8, 128>}, {transform_indices = @transform_1, window_bounds = array<i64: 128, 128>}, {transform_indices = @transform_2, window_bounds = array<i64: 1, 128>}, {transform_indices = @transform_3, window_bounds = array<i64: 8, 4>}, {transform_indices = @transform_4, window_bounds = array<i64: 8, 128>}, {transform_indices = @transform_5, window_bounds = array<i64: 8, 1>}, {transform_indices = @transform_6, window_bounds = array<i64: 8, 1>}]} {
    %c0_i32 = arith.constant 0 : i32
    %0 = arith.cmpi eq, %arg1, %c0_i32 : i32
    %1 = arith.extui %0 : i1 to i32
    %c0_i32_0 = arith.constant 0 : i32
    %2 = arith.cmpi ne, %1, %c0_i32_0 : i32
    scf.if %2 {
      %cst_27 = arith.constant 0xFF800000 : f32
      %65 = vector.broadcast %cst_27 : f32 to vector<8x1xf32>
      %c0_28 = arith.constant 0 : index
      %c0_29 = arith.constant 0 : index
      %66 = vector.load %arg9[%c0_28, %c0_29] : memref<8x1xf32, #tpu.memory_space<vmem>>, vector<8x1xf32>
      tpu.vector_store %arg9[%c0_28, %c0_29], %65 {strides = array<i32>} : memref<8x1xf32, #tpu.memory_space<vmem>>, vector<8x1xf32>,
      %cst_30 = arith.constant 0.000000e+00 : f32
      %67 = vector.broadcast %cst_30 : f32 to vector<8x1xf32>
      %c0_31 = arith.constant 0 : index
      %c0_32 = arith.constant 0 : index
      %68 = vector.load %arg10[%c0_31, %c0_32] : memref<8x1xf32, #tpu.memory_space<vmem>>, vector<8x1xf32>
      tpu.vector_store %arg10[%c0_31, %c0_32], %67 {strides = array<i32>} : memref<8x1xf32, #tpu.memory_space<vmem>>, vector<8x1xf32>,
      %cst_33 = arith.constant 0.000000e+00 : f32
      %69 = vector.broadcast %cst_33 : f32 to vector<8x1xf32>
      %c0_34 = arith.constant 0 : index
      %c0_35 = arith.constant 0 : index
      %70 = vector.load %arg11[%c0_34, %c0_35] : memref<8x1xf32, #tpu.memory_space<vmem>>, vector<8x1xf32>
      tpu.vector_store %arg11[%c0_34, %c0_35], %69 {strides = array<i32>} : memref<8x1xf32, #tpu.memory_space<vmem>>, vector<8x1xf32>,
    } else {
    }
    %c0 = arith.constant 0 : index
    %c0_1 = arith.constant 0 : index
    %3 = vector.load %arg2[%c0, %c0_1] : memref<8x128xf32, #tpu.memory_space<vmem>>, vector<8x128xf32>
    %c0_2 = arith.constant 0 : index
    %c0_3 = arith.constant 0 : index
    %4 = vector.load %arg3[%c0_2, %c0_3] : memref<128x128xf32, #tpu.memory_space<vmem>>, vector<128x128xf32>
    %cst = arith.constant dense<0.000000e+00> : vector<8x128xf32>
    %5 = tpu.matmul %3, %4, %cst {dimension_numbers = #tpu.dot_dimension_numbers<[1], [1], [0], [0], [0, 0, 1, 0], [], []>} : vector<8x128xf32>, vector<128x128xf32>, vector<8x128xf32> -> vector<8x128xf32>
    %c0_4 = arith.constant 0 : index
    %c0_5 = arith.constant 0 : index
    %6 = vector.load %arg4[%c0_4, %c0_5] : memref<1x128xf32, #tpu.memory_space<vmem>>, vector<1x128xf32>
    %7 = vector.broadcast %6 : vector<1x128xf32> to vector<8x128xf32>
    %8 = arith.addf %5, %7 : vector<8x128xf32>
    %c0_6 = arith.constant 0 : index
    %c0_7 = arith.constant 0 : index
    %9 = vector.load %arg6[%c0_6, %c0_7] : memref<8x128xf32, #tpu.memory_space<vmem>>, vector<8x128xf32>
    tpu.vector_store %arg6[%c0_6, %c0_7], %8 {strides = array<i32>} : memref<8x128xf32, #tpu.memory_space<vmem>>, vector<8x128xf32>,
    %10 = tpu.iota {dimensions = array<i32: 1>} : vector<8x128xi32>
    %c128_i32 = arith.constant 128 : i32
    %11 = arith.muli %arg1, %c128_i32 : i32
    %12 = vector.broadcast %11 : i32 to vector<8x128xi32>
    %13 = arith.addi %10, %12 : vector<8x128xi32>
    %c0_8 = arith.constant 0 : index
    %c0_9 = arith.constant 0 : index
    %14 = vector.load %arg5[%c0_8, %c0_9] : memref<8x4xi32, #tpu.memory_space<vmem>>, vector<8x4xi32>
    %cst_10 = arith.constant 0.000000e+00 : f32
    %15 = vector.broadcast %cst_10 : f32 to vector<8x128xf32>
    %16 = vector.extract_strided_slice %14 {offsets = [0, 0], sizes = [8, 1], strides = [1, 1]} : vector<8x4xi32> to vector<8x1xi32>
    %17 = vector.broadcast %16 : vector<8x1xi32> to vector<8x128xi32>
    %18 = arith.cmpi eq, %13, %17 : vector<8x128xi32>
    %19 = arith.extui %18 : vector<8x128xi1> to vector<8x128xi32>
    %20 = arith.sitofp %19 : vector<8x128xi32> to vector<8x128xf32>
    %21 = arith.addf %15, %20 : vector<8x128xf32>
    %22 = vector.extract_strided_slice %14 {offsets = [0, 1], sizes = [8, 1], strides = [1, 1]} : vector<8x4xi32> to vector<8x1xi32>
    %23 = vector.broadcast %22 : vector<8x1xi32> to vector<8x128xi32>
    %24 = arith.cmpi eq, %13, %23 : vector<8x128xi32>
    %25 = arith.extui %24 : vector<8x128xi1> to vector<8x128xi32>
    %26 = arith.sitofp %25 : vector<8x128xi32> to vector<8x128xf32>
    %27 = arith.addf %21, %26 : vector<8x128xf32>
    %28 = vector.extract_strided_slice %14 {offsets = [0, 2], sizes = [8, 1], strides = [1, 1]} : vector<8x4xi32> to vector<8x1xi32>
    %29 = vector.broadcast %28 : vector<8x1xi32> to vector<8x128xi32>
    %30 = arith.cmpi eq, %13, %29 : vector<8x128xi32>
    %31 = arith.extui %30 : vector<8x128xi1> to vector<8x128xi32>
    %32 = arith.sitofp %31 : vector<8x128xi32> to vector<8x128xf32>
    %33 = arith.addf %27, %32 : vector<8x128xf32>
    %34 = vector.extract_strided_slice %14 {offsets = [0, 3], sizes = [8, 1], strides = [1, 1]} : vector<8x4xi32> to vector<8x1xi32>
    %35 = vector.broadcast %34 : vector<8x1xi32> to vector<8x128xi32>
    %36 = arith.cmpi eq, %13, %35 : vector<8x128xi32>
    %37 = arith.extui %36 : vector<8x128xi1> to vector<8x128xi32>
    %38 = arith.sitofp %37 : vector<8x128xi32> to vector<8x128xf32>
    %39 = arith.addf %33, %38 : vector<8x128xf32>
    %c0_11 = arith.constant 0 : index
    %c0_12 = arith.constant 0 : index
    %40 = vector.load %arg11[%c0_11, %c0_12] : memref<8x1xf32, #tpu.memory_space<vmem>>, vector<8x1xf32>
    %41 = arith.mulf %39, %8 : vector<8x128xf32>
    %cst_13 = arith.constant dense<0.000000e+00> : vector<8xf32>
    %42 = vector.multi_reduction <add>, %41, %cst_13 [1] : vector<8x128xf32> to vector<8xf32>
    %43 = vector.shape_cast %42 : vector<8xf32> to vector<8x1xf32>
    %44 = arith.addf %40, %43 : vector<8x1xf32>
    %c0_14 = arith.constant 0 : index
    %c0_15 = arith.constant 0 : index
    %45 = vector.load %arg11[%c0_14, %c0_15] : memref<8x1xf32, #tpu.memory_space<vmem>>, vector<8x1xf32>
    tpu.vector_store %arg11[%c0_14, %c0_15], %44 {strides = array<i32>} : memref<8x1xf32, #tpu.memory_space<vmem>>, vector<8x1xf32>,
    %c0_16 = arith.constant 0 : index
    %c0_17 = arith.constant 0 : index
    %46 = vector.load %arg9[%c0_16, %c0_17] : memref<8x1xf32, #tpu.memory_space<vmem>>, vector<8x1xf32>
    %cst_18 = arith.constant dense<0xFF800000> : vector<8xf32>
    %47 = vector.multi_reduction <maximumf>, %8, %cst_18 [1] : vector<8x128xf32> to vector<8xf32>
    %48 = vector.shape_cast %47 : vector<8xf32> to vector<8x1xf32>
    %49 = arith.maximumf %46, %48 : vector<8x1xf32>
    %c0_19 = arith.constant 0 : index
    %c0_20 = arith.constant 0 : index
    %50 = vector.load %arg10[%c0_19, %c0_20] : memref<8x1xf32, #tpu.memory_space<vmem>>, vector<8x1xf32>
    %51 = arith.subf %46, %49 : vector<8x1xf32>
    %52 = math.exp %51 : vector<8x1xf32>
    %53 = arith.mulf %50, %52 : vector<8x1xf32>
    %54 = vector.broadcast %49 : vector<8x1xf32> to vector<8x128xf32>
    %55 = arith.subf %8, %54 : vector<8x128xf32>
    %56 = math.exp %55 : vector<8x128xf32>
    %cst_21 = arith.constant dense<0.000000e+00> : vector<8xf32>
    %57 = vector.multi_reduction <add>, %56, %cst_21 [1] : vector<8x128xf32> to vector<8xf32>
    %58 = vector.shape_cast %57 : vector<8xf32> to vector<8x1xf32>
    %59 = arith.addf %53, %58 : vector<8x1xf32>
    %c0_22 = arith.constant 0 : index
    %c0_23 = arith.constant 0 : index
    %60 = vector.load %arg10[%c0_22, %c0_23] : memref<8x1xf32, #tpu.memory_space<vmem>>, vector<8x1xf32>
    tpu.vector_store %arg10[%c0_22, %c0_23], %59 {strides = array<i32>} : memref<8x1xf32, #tpu.memory_space<vmem>>, vector<8x1xf32>,
    %c0_24 = arith.constant 0 : index
    %c0_25 = arith.constant 0 : index
    %61 = vector.load %arg9[%c0_24, %c0_25] : memref<8x1xf32, #tpu.memory_space<vmem>>, vector<8x1xf32>
    tpu.vector_store %arg9[%c0_24, %c0_25], %49 {strides = array<i32>} : memref<8x1xf32, #tpu.memory_space<vmem>>, vector<8x1xf32>,
    %c3_i32 = arith.constant 3 : i32
    %62 = arith.cmpi eq, %arg1, %c3_i32 : i32
    %63 = arith.extui %62 : i1 to i32
    %c0_i32_26 = arith.constant 0 : i32
    %64 = arith.cmpi ne, %63, %c0_i32_26 : i32
    scf.if %64 {
      %c0_27 = arith.constant 0 : index
      %c0_28 = arith.constant 0 : index
      %65 = vector.load %arg9[%c0_27, %c0_28] : memref<8x1xf32, #tpu.memory_space<vmem>>, vector<8x1xf32>
      %c0_29 = arith.constant 0 : index
      %c0_30 = arith.constant 0 : index
      %66 = vector.load %arg10[%c0_29, %c0_30] : memref<8x1xf32, #tpu.memory_space<vmem>>, vector<8x1xf32>
      %67 = math.log %66 : vector<8x1xf32>
      %68 = arith.addf %65, %67 : vector<8x1xf32>
      %c0_31 = arith.constant 0 : index
      %c0_32 = arith.constant 0 : index
      %69 = vector.load %arg7[%c0_31, %c0_32] : memref<8x1xf32, #tpu.memory_space<vmem>>, vector<8x1xf32>
      tpu.vector_store %arg7[%c0_31, %c0_32], %68 {strides = array<i32>} : memref<8x1xf32, #tpu.memory_space<vmem>>, vector<8x1xf32>,
      %c0_33 = arith.constant 0 : index
      %c0_34 = arith.constant 0 : index
      %70 = vector.load %arg11[%c0_33, %c0_34] : memref<8x1xf32, #tpu.memory_space<vmem>>, vector<8x1xf32>
      %c0_35 = arith.constant 0 : index
      %c0_36 = arith.constant 0 : index
      %71 = vector.load %arg8[%c0_35, %c0_36] : memref<8x1xf32, #tpu.memory_space<vmem>>, vector<8x1xf32>
      tpu.vector_store %arg8[%c0_35, %c0_36], %70 {strides = array<i32>} : memref<8x1xf32, #tpu.memory_space<vmem>>, vector<8x1xf32>,
    } else {
    }
    return
  }
  func.func @transform_0(%arg0: i32, %arg1: i32) -> (i32, i32) {
    %c0_i32 = arith.constant 0 : i32
    %c0_i32_0 = arith.constant 0 : i32
    return %arg0, %c0_i32 : i32, i32
  }
  func.func @transform_1(%arg0: i32, %arg1: i32) -> (i32, i32) {
    %c0_i32 = arith.constant 0 : i32
    %c0_i32_0 = arith.constant 0 : i32
    return %arg1, %c0_i32 : i32, i32
  }
  func.func @transform_2(%arg0: i32, %arg1: i32) -> (i32, i32) {
    %c0_i32 = arith.constant 0 : i32
    %c0_i32_0 = arith.constant 0 : i32
    return %c0_i32, %arg1 : i32, i32
  }
  func.func @transform_3(%arg0: i32, %arg1: i32) -> (i32, i32) {
    %c0_i32 = arith.constant 0 : i32
    %c0_i32_0 = arith.constant 0 : i32
    return %arg0, %c0_i32 : i32, i32
  }
  func.func @transform_4(%arg0: i32, %arg1: i32) -> (i32, i32) {
    %c0_i32 = arith.constant 0 : i32
    return %arg0, %arg1 : i32, i32
  }
  func.func @transform_5(%arg0: i32, %arg1: i32) -> (i32, i32) {
    %c0_i32 = arith.constant 0 : i32
    %c0_i32_0 = arith.constant 0 : i32
    return %arg0, %c0_i32 : i32, i32
  }
  func.func @transform_6(%arg0: i32, %arg1: i32) -> (i32, i32) {
    %c0_i32 = arith.constant 0 : i32
    %c0_i32_0 = arith.constant 0 : i32
    return %arg0, %c0_i32 : i32, i32
  }
}

</mosaic_0001>

<bundles_post_ra>
// kernel: tpu_custom_call.1
= control target key start
LH: loop header
LB: loop body
LE: loop exit
PB: predicated region body
PF: predicated region fallthrough
CT: control target
= control target key end

     0   :  { %12 = vsyncpa [#allocation6], 0  ;;  %s1301_s0 = inlined_call_operand.vmem [shape: f32[8,128], index: 0, kind: input, shape index: {}]   ;;  %s1302_s1 = inlined_call_operand.hbm [shape: f32[512,128], index: 1, kind: input, shape index: {}]   ;;  %s1303_s2 = inlined_call_operand.vmem [shape: f32[1,512], index: 2, kind: input, shape index: {}]   ;;  %s1304_s3 = inlined_call_operand.vmem [shape: s32[8,4], index: 3, kind: input, shape index: {}]   ;;  %s1305_s4 = inlined_call_operand.hbm [shape: f32[8,512], index: 4, kind: output, shape index: {0}]   ;;  %s1306_s5 = inlined_call_operand.vmem [shape: f32[8,1], index: 5, kind: output, shape index: {1}]   ;;  %s1307_s6 = inlined_call_operand.vmem [shape: f32[8,1], index: 6, kind: output, shape index: {2}]  }
   0x1   :  { %14 = vsyncpa [#allocation6 + $0x1], 0 }
   0x2   :  { %15 = vsyncpa [#allocation7], 0 }
   0x3   :  { %17 = vsyncpa [#allocation7 + $0x1], 0  ;;  %s1072_s21 = smov 0   ;;  %s1074_s22 = smov 0  }
   0x4   :  { %s1076_s23 = smov 0   ;;  %s1078_s24 = smov 0  }
   0x5   :  { %s1080_s25 = smov 0   ;;  %s1082_s26 = smov 0  }
   0x6 LB: > { %s723_s27 = sadd.s32 4294967295, %s1022_s26   ;;  %s724_s28 = sadd.s32 4294967294, %s1022_s26   ;;  %s1022_s26 = sphi %s1082_s26, %s23_s26   ;;  %s1018_s25 = sphi %s1080_s25, %s1321_s25   ;;  %s1014_s24 = sphi %s1078_s24, %s1320_s24   ;;  %s1010_s23 = sphi %s1076_s23, %s1319_s23   ;;  %s1006_s22 = sphi %s1074_s22, %s1318_s22   ;;  %s1002_s21 = sphi %s1072_s21, %s1317_s21  }
   0x7   : > { %s32_s29 = sadd.s32 1, %s1018_s25  ;;  %s68_s30 = sadd.s32 1, %s1010_s23 }
   0x8   : > { %p33_p0 = scmp.ge.s32.totalorder %s32_s29, 4  ;;  %p75_p1 = scmp.ne.s32.totalorder %s1010_s23, %s1006_s22 }
   0x9   : > { %p76_p2 = scmp.eq.s32.totalorder %s1022_s26, 0  ;;  %p81_p3 = scmp.ne.s32.totalorder %s1006_s22, %s1002_s21 }
   0xa   : > { %s1323_s29 = smov (%p33_p0, %s32_s29), 0  ;;  %p82_p5 = scmp.eq.s32.totalorder %s723_s27, 0 }
   0xb   : > { %p1113_p4 = por %p76_p2, %p75_p1  ;;  %s65_s8 = ssub.s32 %s1018_s25, %s1323_s29 }
   0xc   : > { %p159_p6 = scmp.eq.s32.totalorder %s723_s27, 3  ;;  %p66_p7 = scmp.eq.s32.totalorder %s65_s8, 0 }
   0xd   : > { %p1119_p8 = por %p82_p5, %p81_p3  ;;  %p165_p10 = scmp.eq.s32.totalorder %s724_s28, 3 }
   0xe   : > { %p1123_p9 = por %p159_p6, %p75_p1  ;;  %p838_p12 = scmp.lt.s32.totalorder %s1022_s26, 4 }
   0xf   : > { %s1128_s11 = scalar_select %p66_p7, %s1010_s23, %s68_s30  }
  0x10   : > { %s1311_s10 = scalar_select %p1123_p9, 1, 0 }
  0x11   : > { %p1130_p11 = por %p165_p10, %p81_p3  ;;  %s251_s13 = sand.u32 1, %s1010_s23  }
  0x12   : > { %s729_s14 = sshll.u32 %s251_s13, 7  ;;  %s749_s15 = sshll.u32 %s1018_s25, 11 }
  0x13   : > { %s1312_s12 = scalar_select %p1130_p11, 1, 0 }
  0x14   : > { %s1140_s18 = scalar_lea.hbm %s1302_s1, %s749_s15  ;;  %s255_s19 = scalar_lea.vmem [#allocation5], %s729_s14 }
  0x15   : > { %s262_s20 = sshll.u32 %s255_s19, 4  ;;  %p1146_p13 = pnand %p838_p12, %p1113_p4  ;;  %s1142_s20 = int_to_ptr.vmem [resolvable:$true] %s262_s20 }
  0x16   : > { %s1151_s28 = scalar_lea.sflag [#allocation6], %s251_s13  ;;  %s910_s30 = scalar_lea.hbm %s1140_s18, 2048 }
  0x17   : > { %p911_p1 = scmp.ne.s32.totalorder %s1140_s18, %s910_s30  ;;  %p912_p2 = pneg %p1146_p13 }
  0x18   : > { %s915_s7 = scalar_lea.hbm %s1302_s1, 8192  ;;  %p916_p4 = scmp.lt.u32.totalorder %s1140_s18, %s1302_s1 }
  0x19   : > { %p913_p3 = pnand %p912_p2, %p911_p1  ;;  %p917_p6 = scmp.lt.u32.totalorder %s915_s7, %s910_s30 }
  0x1a   : > { %p919_p10 = scmp.lt.u32.totalorder %s910_s30, %s1140_s18 }
  0x1b   : > { %p914_p5 = pneg %p913_p3  ;;  %p918_p7 = por %p917_p6, %p916_p4 }
  0x1d   : > { %p920_p12 = por %p919_p10, %p918_p7 }
  0x1f   : > { %p921_p0 = pnand %p920_p12, %p914_p5 }
  0x21   : > { %924 = shalt.err (!%p921_p0)
}
  0x22   : > { %s925_s13 = scalar_lea.vmem %s1142_s20, 2048  ;;  %s1024_s17 = smov [#allocation5]  }
  0x23   : > { %p926_p1 = scmp.ne.s32.totalorder %s1142_s20, %s925_s13  ;;  %s930_s19 = sshll.u32 %s1024_s17, 4  ;;  %s931_s19 = int_to_ptr.vmem [resolvable:$false] %s930_s19 }
  0x24   : > { %s932_s8 = scalar_lea.vmem %s931_s19, 4096  ;;  %p933_p9 = scmp.lt.s32.totalorder %s1142_s20, %s931_s19 }
  0x25   : > { %p928_p3 = pnand %p926_p1, %p912_p2  ;;  %p934_p4 = scmp.lt.s32.totalorder %s932_s8, %s925_s13 }
  0x27   : > { %p929_p11 = pneg %p928_p3  ;;  %p935_p6 = por %p934_p4, %p933_p9 }
  0x29   : > { %p936_p7 = pnand %p935_p6, %p929_p11 }
  0x2b   : > { %939 = shalt.err (!%p936_p7)
}
  0x2c   : > { %s1025_s30 = smov 128   ;;  %s1026_s14 = smov 8  }
  0x2d   : > { %833 = dma.hbm_to_vmem [thread:$0]  (!%p1146_p13), %s1140_s18, 2048, %s1142_s20, %s1151_s28, %s1025_s30, %s1025_s30, %s1026_s14  }
  0x2e   : > { %p276_p0 = scmp.lt.s32.totalorder %s1022_s26, 5  ;;  %p1314_p2 = scmp.ge.s32.totalorder %s1022_s26, 1 }
  0x30   : > { %p277_p5 = pnand %p1314_p2, %p276_p0 }
  0x31   : > { %s1183_s7 = sand.u32 (!%p277_p5), 1, %s1006_s22  }
  0x32   : > { %280 = sbr.rel (%p277_p5) target bundleno = 828 (0x33c), region = 36  ;;  %s733_s15 = sshll.u32 (!%p277_p5), %s1183_s7, 7 }
  0x33   : > { %s283_s16 = scalar_lea.sflag (!%p277_p5), [#allocation6], %s1183_s7  ;;  %s1187_s13 = scalar_lea.vmem (!%p277_p5), [#allocation5], %s733_s15 }
  0x39   : > { %993 = dma.done.wait (%p1119_p8), %s283_s16, 2048  }
  0x3a   : > { %995 = vsyncadd (%p1119_p8), %s283_s16, 4294965248  ;;  %s734_s18 = sshll.u32 %s1183_s7, 3  ;;  %p339_p9 = scmp.lt.s32.totalorder %s1014_s24, 3 }
  0x3b   : > { %s1202_s19 = scalar_lea.vmem [#allocation8], %s734_s18  ;;  %p735_p11 = scmp.ne.s32.totalorder %s1014_s24, 0 }
  0x3c   : > { %s1196_s20 = scalar_select %p339_p9, %s1014_s24, 3 }
  0x3d   : > { %357 = sbr.rel (%p735_p11) target bundleno = 68 (0x44), region = 44  ;;  %vm358_vm0 = vcmask (!%p735_p11), 7168   ;;  %v1027_v0 = vmov (!%p735_p11), -inf   ;;  %v1028_v1 = vmov (!%p735_p11), 0.0  }
  0x3e   : > { %s341_s17 = scalar_lea.vmem %s1303_s2, %s1196_s20  ;;  %359 = vst.msk [vmem:[#allocation2] sm:$0xff] (!%p735_p11), %vm358_vm0, %v1027_v0  ;;  %360 = vst.msk [vmem:[#allocation3] sm:$0xff] (!%p735_p11), %vm358_vm0, %v1028_v1 }
  0x3f   : > { %361 = vst.msk [vmem:[#allocation4] sm:$0xff] (!%p735_p11), %vm358_vm0, %v1028_v1 }
  0x44 PF: > { %v363_v2 = vld [vmem:[%s1187_s13] sm:$0xff]  ;;  %v364_v3 = vld [vmem:[%s1187_s13 + $0x8] sm:$0xff]  ;;  %v1029_v4 = vmov 0.0|0.0   ;;  %vm1030_vm1 = vmmov 0   ;;  %v1031_v6 = vmov 0.0   ;;  %v1032_v7 = vmov 0  }
  0x45   : > { %802 = vmatprep.subr.bf16.mxu0 %v1029_v4  ;;  %v803_v5 = vpack.c.bf16 %v364_v3, %v363_v2  ;;  %799 = vmatprep.mubr.msk.f32.mxu0 %vm1030_vm1, %v1031_v6  ;;  %v365_v8 = vld [vmem:[%s1187_s13 + $0x10] sm:$0xff]  ;;  %v366_v9 = vld [vmem:[%s1187_s13 + $0x18] sm:$0xff]  ;;  %v462_v10 = vld [vmem:[%s1304_s3] sm:$0xff]  ;;  %v1033_v12 = vmov 1   ;;  %v1034_v16 = vmov 2   ;;  %v1035_v19 = vmov 3  }
  0x46   : > { %900 = vset.pattern.permute.xlu1 %v1032_v7  ;;  %899 = vset.pattern.permute.xlu0 %v1032_v7  ;;  %v806_v11 = vpack.c.bf16 %v366_v9, %v365_v8  ;;  %v367_v13 = vld [vmem:[%s1187_s13 + $0x20] sm:$0xff]  ;;  %v368_v14 = vld [vmem:[%s1187_s13 + $0x28] sm:$0xff]  ;;  %v369_v17 = vld [vmem:[%s1187_s13 + $0x30] sm:$0xff]  ;;  %v457_v35 = vlaneseq  ;;  %s737_s15 = sshll.u32 %s1014_s24, 7  ;;  %vm496_vm6 = vcmask 7168   ;;  %p742_p8 = scmp.ne.s32.totalorder %s1014_s24, 3 }
  0x47   : > { %804 = vmatpush3.bf16.xpose.msra.mxu0 %v803_v5  ;;  %464 = vperm.xlu1 %900, %v462_v10   ;;  %v809_v15 = vpack.c.bf16 %v368_v14, %v367_v13  ;;  %v370_v18 = vld [vmem:[%s1187_s13 + $0x38] sm:$0xff]  ;;  %v371_v21 = vld [vmem:[%s1187_s13 + $0x40] sm:$0xff]  ;;  %v372_v22 = vld [vmem:[%s1187_s13 + $0x48] sm:$0xff]  ;;  %v460_v37 = vstv %s737_s15 }
  0x48   : > { %805 = vmatprep.subr.bf16.mxu0 %v1029_v4  ;;  %v812_v20 = vpack.c.bf16 %v370_v18, %v369_v17  ;;  %v815_v23 = vpack.c.bf16 %v372_v22, %v371_v21  ;;  %v373_v24 = vld [vmem:[%s1187_s13 + $0x50] sm:$0xff]  ;;  %v374_v25 = vld [vmem:[%s1187_s13 + $0x58] sm:$0xff]  ;;  %v375_v27 = vld [vmem:[%s1187_s13 + $0x60] sm:$0xff]  ;;  %v458_v36 = vand.u32 127, %v457_v35 }
  0x49   : > { %v818_v26 = vpack.c.bf16 %v374_v25, %v373_v24  ;;  %v376_v28 = vld [vmem:[%s1187_s13 + $0x68] sm:$0xff]  ;;  %v377_v30 = vld [vmem:[%s1187_s13 + $0x70] sm:$0xff]  ;;  %v378_v31 = vld [vmem:[%s1187_s13 + $0x78] sm:$0xff] }
  0x4a   : > { %v821_v29 = vpack.c.bf16 %v376_v28, %v375_v27  ;;  %v824_v32 = vpack.c.bf16 %v378_v31, %v377_v30  ;;  %v362_v33 = vld [vmem:[%s1301_s0] sm:$0xff]  ;;  %v461_v39 = vadd.s32 %v460_v37, %v458_v36  ;;  %v491_v56 = vld [vmem:[#allocation4] sm:$0xff]  ;;  %v502_v3 = vld [vmem:[#allocation3] sm:$0xff] }
  0x4b   : > { %901 = vset.pattern.permute.xlu1 %v1033_v12  ;;  %v736_v48 = vld [vmem:[%s341_s17] ss:$0 sm:$0xff] }
  0x4c   : > { %471 = vperm.xlu1 %901, %v462_v10   ;;  %v498_v54 = vld [vmem:[#allocation2] sm:$0xff] }
  0x4f   : > { %807 = vmatpush3.bf16.xpose.msra.mxu0 %v806_v11 }
  0x50   : > { %808 = vmatprep.subr.bf16.mxu0 %v1029_v4  ;;  %902 = vset.pattern.permute.xlu1 %v1034_v16 }
  0x51   : > { %478 = vperm.xlu1 %902, %v462_v10  }
  0x55   : > { %903 = vset.pattern.permute.xlu1 %v1035_v19 }
  0x56   : > { %485 = vperm.xlu1 %903, %v462_v10  }
  0x57   : > { %810 = vmatpush3.bf16.xpose.msra.mxu0 %v809_v15 }
  0x58   : > { %811 = vmatprep.subr.bf16.mxu0 %v1029_v4 }
  0x5f   : > { %813 = vmatpush3.bf16.xpose.msra.mxu0 %v812_v20 }
  0x60   : > { %814 = vmatprep.subr.bf16.mxu0 %v1029_v4 }
  0x67   : > { %816 = vmatpush3.bf16.xpose.msra.mxu0 %v815_v23 }
  0x68   : > { %817 = vmatprep.subr.bf16.mxu0 %v1029_v4 }
  0x6f   : > { %819 = vmatpush3.bf16.xpose.msra.mxu0 %v818_v26 }
  0x70   : > { %820 = vmatprep.subr.bf16.mxu0 %v1029_v4 }
  0x77   : > { %822 = vmatpush3.bf16.xpose.msra.mxu0 %v821_v29 }
  0x78   : > { %823 = vmatprep.subr.bf16.mxu0 %v1029_v4 }
  0x7f   : > { %825 = vmatpush3.bf16.xpose.msra.mxu0 %v824_v32 }
  0x86   : > { %800 = vmatmul.mubr.f32.vlgmr.msra.gmra.mrb[0].mxu0 %v362_v33 }
  0xc6   : > { %v465_v34 = vpop.permute.xlu1 %464 }
  0xc7   : > { %vm466_vm2 = vcmp.eq.s32.totalorder %v461_v39, %v465_v34 }
  0xc8   : > { %v738_v41 = vsel %vm466_vm2, 1.0, %v1031_v6 }
  0xcb   : > { %v472_v38 = vpop.permute.xlu1 %471 }
  0xcc   : > { %vm473_vm3 = vcmp.eq.s32.totalorder %v461_v39, %v472_v38 }
  0xcd   : > { %v739_v42 = vsel %vm473_vm3, 1.0, %v1031_v6 }
  0xce   : > { %v476_v44 = vadd.f32 %v739_v42, %v738_v41 }
  0xd0   : > { %v479_v40 = vpop.permute.xlu1 %478 }
  0xd1   : > { %vm480_vm4 = vcmp.eq.s32.totalorder %v461_v39, %v479_v40 }
  0xd2   : > { %v740_v45 = vsel %vm480_vm4, 1.0, %v1031_v6 }
  0xd3   : > { %v483_v46 = vadd.f32 %v740_v45, %v476_v44 }
  0xd5   : > { %v486_v43 = vpop.permute.xlu1 %485 }
  0xd6   : > { %vm487_vm5 = vcmp.eq.s32.totalorder %v461_v39, %v486_v43 }
  0xd7   : > { %v741_v47 = vsel %vm487_vm5, 1.0, %v1031_v6 }
  0xd8   : > { %v490_v49 = vadd.f32 %v741_v47, %v483_v46 }
 0x159   : > { %v452_v50 = vpop.f32.mrb[0].mxu0 }
 0x15a   : > { %v453_v51 = vadd.f32 %v736_v48, %v452_v50  ;;  %v801_v52 = vpop.f32.mrb[1].mxu0 }
 0x15c   : > { %456 = vst [vmem:[%s1202_s19] sm:$0xff] %v453_v51  ;;  %499 = vmax.xlane.f32.xlu0 %v453_v51  ;;  %v492_v53 = vmul.f32 %v490_v49, %v453_v51 }
 0x15e   : > { %493 = vadd.xlane.f32.xlu1 %v492_v53 }
 0x1e9   : > { %v500_v55 = vpop.xlane.xlu0 %499 }
 0x1ea   : > { %v501_v57 = vmax.f32 %v498_v54, %v500_v55 }
 0x1eb   : > { %v494_v58 = vpop.xlane.xlu1 %493 }
 0x1ec   : > { %v503_v59 = vsub.f32 %v498_v54, %v501_v57  ;;  %519 = vst.msk [vmem:[#allocation2] sm:$0xff] %vm496_vm6, %v501_v57  ;;  %v495_v60 = vadd.f32 %v494_v58, %v491_v56  ;;  %509 = vperm.xlu0 %899, %v501_v57  }
 0x1ee   : > { %497 = vst.msk [vmem:[#allocation4] sm:$0xff] %vm496_vm6, %v495_v60  ;;  %v504_v1 = vmul.f32 1.442695, %v503_v59 }
 0x1f3   : > { %v524_v10 = vld [vmem:[#allocation2] sm:$0xff] (!%p742_p8) }
 0x1f5   : > { %v530_v8 = vld [vmem:[#allocation4] sm:$0xff] (!%p742_p8) }
 0x1f6   : > { %531 = vst.msk [vmem:[%s1307_s6] sm:$0xff] (!%p742_p8), %vm496_vm6, %v530_v8 }
 0x26b   : > { %v510_v61 = vpop.permute.xlu0 %509 }
 0x26c   : > { %v512_v62 = vsub.f32 %v453_v51, %v510_v61 }
 0x26e   : > { %v513_v63 = vmul.f32 1.442695, %v512_v62 }
 0x270   : > { %904 = vpow2.f32 %v513_v63 }
 0x271   : > { %906 = vpow2.f32 %v504_v1 }
 0x27a   : > { %v905_v0 = vpop.eup %904 }
 0x27b   : > { %515 = vadd.xlane.f32.xlu0 %v905_v0  ;;  %v907_v2 = vpop.eup %906 }
 0x27c   : > { %v506_v4 = vmul.f32 %v907_v2, %v502_v3 }
 0x305   : > { %523 = sbr.rel (%p742_p8) target bundleno = 803 (0x323), region = 48 }
 0x308   : > { %v516_v5 = vpop.xlane.xlu0 %515 }
 0x309   : > { %v517_v6 = vadd.f32 %v516_v5, %v506_v4 }
 0x30b   : > { %518 = vst.msk [vmem:[#allocation3] sm:$0xff] %vm496_vm6, %v517_v6 }
 0x312   : > { %v525_v7 = vld [vmem:[#allocation3] sm:$0xff] }
 0x313   : > { %908 = vlog2.f32 %v525_v7 }
 0x31d   : > { %v909_v9 = vpop.eup %908 }
 0x31e   : > { %v527_v11 = vmul.f32 0.6931472, %v909_v9 }
 0x320   : > { %v528_v12 = vadd.f32 %v527_v11, %v524_v10 }
 0x322   : > { %529 = vst.msk [vmem:[%s1306_s5] sm:$0xff] %vm496_vm6, %v528_v12 }
 0x323 PF: > { %s1258_s8 = scalar_lea.hbm %s1305_s4, %s737_s15  ;;  %s556_s30 = sshll.u32 %s1202_s19, 4  ;;  %s557_s30 = int_to_ptr.vmem [resolvable:$true] %s556_s30 }
 0x324   : > { %s533_s14 = scalar_lea.sflag [#allocation7], %s1183_s7  ;;  %s940_s16 = scalar_lea.vmem %s557_s30, 128 }
 0x325   : > { %p941_p13 = scmp.ne.s32.totalorder %s557_s30, %s940_s16  ;;  %p1315_p10 = scmp.ne.s32.totalorder %s1311_s10, 0 }
 0x326   : > { %s1036_s13 = smov [#allocation8]  }
 0x327   : > { %p942_p12 = pnand %p941_p13, %p1315_p10  ;;  %s944_s18 = sshll.u32 %s1036_s13, 4  ;;  %s945_s18 = int_to_ptr.vmem [resolvable:$false] %s944_s18 }
 0x328   : > { %s946_s24 = scalar_lea.vmem %s945_s18, 256  ;;  %p947_p3 = scmp.lt.s32.totalorder %s557_s30, %s945_s18 }
 0x329   : > { %p943_p1 = pneg %p942_p12  ;;  %p948_p4 = scmp.lt.s32.totalorder %s946_s24, %s940_s16 }
 0x32b   : > { %p949_p6 = por %p948_p4, %p947_p3 }
 0x32d   : > { %p950_p7 = pnand %p949_p6, %p943_p1 }
 0x32f   : > { %953 = shalt.err (!%p950_p7)
}
 0x330   : > { %s954_s7 = scalar_lea.hbm %s1258_s8, 128  ;;  %s958_s20 = scalar_lea.hbm %s1305_s4, 512 }
 0x331   : > { %p955_p0 = scmp.ne.s32.totalorder %s1258_s8, %s954_s7  ;;  %p959_p9 = scmp.lt.u32.totalorder %s1258_s8, %s1305_s4 }
 0x332   : > { %p960_p11 = scmp.lt.u32.totalorder %s958_s20, %s954_s7  ;;  %p962_p13 = scmp.lt.u32.totalorder %s954_s7, %s1258_s8 }
 0x333   : > { %p956_p2 = pnand %p955_p0, %p1315_p10 }
 0x334   : > { %p961_p8 = por %p960_p11, %p959_p9 }
 0x335   : > { %p957_p5 = pneg %p956_p2 }
 0x336   : > { %p963_p12 = por %p962_p13, %p961_p8 }
 0x338   : > { %p964_p1 = pnand %p963_p12, %p957_p5 }
 0x33a   : > { %967 = shalt.err (!%p964_p1)
}
 0x33b   : > { %828 = dma.vmem_to_hbm [thread:$0]  (%p1315_p10), %s557_s30, 128, %s1258_s8, %s533_s14  }
 0x33c PF: > { %p839_p3 = scmp.ge.s32.totalorder %s1022_s26, 2  ;;  %s588_s17 = sand.u32 1, %s1002_s21  }
 0x33d   : > { %p1316_p4 = scmp.ne.s32.totalorder %s1312_s12, 0  ;;  %s589_s9 = scalar_lea.sflag [#allocation7], %s588_s17 }
 0x33f   : > { %p835_p6 = pnand %p839_p3, %p1316_p4 }
 0x341   : > { %997 = dma.done.wait (!%p835_p6), %s589_s9, 128  }
 0x342   : > { %999 = vsyncadd (!%p835_p6), %s589_s9, 4294967168  ;;  %s23_s26 = sadd.s32 1, %s1022_s26   ;;  %s1317_s21 = smov %s1006_s22 }
 0x343   : > { %p20_p7 = scmp.ge.s32.totalorder %s23_s26, 6   ;;  %s1318_s22 = smov %s1010_s23 }
 0x344   : > { %s1319_s23 = smov %s1128_s11  ;;  %s1320_s24 = smov %s1018_s25 }
 0x345   : > { %s1321_s25 = smov %s1323_s29  ;;  %22 = sbr.rel (!%p20_p7) target bundleno = 6 (0x6), region = 122 }
 0x34c   :  { %594 = vsyncpa [#allocation6], 1 }
 0x34d   :  { %596 = vsyncpa [#allocation6 + $0x1], 1 }
 0x34e   :  { %597 = vsyncpa [#allocation7], 1 }
 0x34f   :  { %599 = vsyncpa [#allocation7 + $0x1], 1 }

</bundles_post_ra>
